<compile_context>
chip_gen: v7x
topology: tpu7x:2x2x1
jax: 0.10.0
libtpu: 0.0.40
codegen_flags: <defaults>
</compile_context>

<pallas_src>
import functools
import math

import jax
import jax.numpy as jnp
from jax import lax
from jax.experimental import pallas as pl
from jax.experimental.pallas import tpu as pltpu


# --------------------------------------------------------------------------
# Kernel: per-batch-item stride-2 3x3 conv as one im2row matmul
# --------------------------------------------------------------------------
def _downsample_kernel(xd_ref, wt_ref, b_ref, o_ref, xpad_ref, *,
                       Hout, Wout, Cp, mxu_dtype):
    """xd_ref  : (1, Hout, Wout, Cp)    space-to-depth input, Cp = 4*Cin
       wt_ref  : (Cout, 4*Cp)           zero-expanded, transposed conv weight
       b_ref   : (Cout, 1)              bias
       o_ref   : (1, Cout, Hout*Wout)   flat NCHW output slab
       xpad_ref: (Hout+1, Wout+1, Cp)   VMEM scratch, top/left zero padding"""
    # In-kernel padding: zero the scratch, write the tile into its interior
    # (replaces host-side jnp.pad -> saves a full extra HBM pass of the input).
    xpad_ref[...] = jnp.zeros((Hout + 1, Wout + 1, Cp), jnp.float32)
    xpad_ref[pl.ds(1, Hout), pl.ds(1, Wout), :] = xd_ref[0]
    xp = xpad_ref[...]

    # im2row: 4 contiguous shifted windows of the packed image concatenated
    # along the contraction (lane) axis -> (Hout*Wout, 4*Cp).  Together with the
    # zero-expanded weight this is the whole 3x3/stride-2 conv as ONE dot.
    slab = jnp.concatenate(
        [xp[ay:ay + Hout, ax:ax + Wout, :] for ay in (0, 1) for ax in (0, 1)],
        axis=-1,
    ).reshape(Hout * Wout, 4 * Cp).astype(mxu_dtype)

    # (Cout, K) x (Hout*Wout, K)^T -> (Cout, Hout*Wout): the output is produced
    # directly in flat NCHW layout (no in-kernel reshape; lane dim = Hout*Wout).
    acc = lax.dot_general(
        wt_ref[...], slab,
        dimension_numbers=(((1,), (1,)), ((), ())),
        preferred_element_type=jnp.float32,
    )
    o_ref[0] = (acc + b_ref[...]).astype(o_ref.dtype)


# --------------------------------------------------------------------------
# Weight repack: (3,3,Cin,Cout) HWIO -> zero-expanded (Cout, 16*Cin)
# --------------------------------------------------------------------------
def _expand_weight_t(w_hwio):
    """Map tap (dy,dx) to the (window-shift, parity) basis used by the kernel's
    space-to-depth slab; taps that fall outside the 3x3 window get zero rows."""
    _, _, Cin, Cout = w_hwio.shape
    Cp = 4 * Cin
    w_big = jnp.zeros((4 * Cp, Cout), w_hwio.dtype)
    tap = {0: (0, 1), 1: (1, 0), 2: (1, 1)}           # d -> (shift, parity)
    for dy in range(3):
        ay, p = tap[dy]
        for dx in range(3):
            ax, q = tap[dx]
            row = (ay * 2 + ax) * Cp + (p * 2 + q) * Cin
            w_big = w_big.at[row:row + Cin, :].set(w_hwio[dy, dx])
    return w_big.T                                     # (Cout, 4*Cp)


# --------------------------------------------------------------------------
# Wrapper
# --------------------------------------------------------------------------
def downsample_pallas(x_nchw, w_hwio, b, *, mxu_dtype=jnp.bfloat16):
    """x: (N, Cin, H, W) f32 NCHW; w: (3,3,Cin,Cout) HWIO; b: (Cout,)."""
    N, Cin, H, W = x_nchw.shape
    Cout = w_hwio.shape[-1]
    assert H % 2 == 0 and W % 2 == 0  # TODO(synk): odd spatial dims unsupported
    Hout, Wout = H // 2, W // 2
    Cp = 4 * Cin

    # Space-to-depth (single layout pass; replaces the NCHW->NHWC transpose).
    xd = x_nchw.reshape(N, Cin, Hout, 2, Wout, 2)
    xd = jnp.transpose(xd, (0, 2, 4, 3, 5, 1)).reshape(N, Hout, Wout, Cp)

    wt = _expand_weight_t(w_hwio).astype(mxu_dtype)    # (Cout, 4*Cp)
    b2 = b.reshape(Cout, 1).astype(jnp.float32)

    kernel = functools.partial(_downsample_kernel, Hout=Hout, Wout=Wout,
                               Cp=Cp, mxu_dtype=mxu_dtype)
    out = pl.pallas_call(
        kernel,
        out_shape=jax.ShapeDtypeStruct((N, Cout, Hout * Wout), jnp.float32),
        grid_spec=pltpu.PrefetchScalarGridSpec(
            num_scalar_prefetch=0,
            grid=(N,),
            in_specs=[
                pl.BlockSpec((1, Hout, Wout, Cp), lambda n: (n, 0, 0, 0)),
                pl.BlockSpec((Cout, 4 * Cp), lambda n: (0, 0)),
                pl.BlockSpec((Cout, 1), lambda n: (0, 0)),
            ],
            out_specs=pl.BlockSpec((1, Cout, Hout * Wout), lambda n: (n, 0, 0)),
            scratch_shapes=[pltpu.VMEM((Hout + 1, Wout + 1, Cp), jnp.float32)],
        ),
        compiler_params=pltpu.CompilerParams(dimension_semantics=("parallel",)),
    )(xd, wt, b2)
    # Output is already flat NCHW -> only a (free) reshape, no transpose pass.
    return out.reshape(N, Cout, Hout, Wout)


# --------------------------------------------------------------------------
# Pure-JAX reference (ground truth for nn.Conv2d(3, stride=2, padding=1))
# --------------------------------------------------------------------------
def downsample_ref(x_nchw, w_hwio, b):
    y = lax.conv_general_dilated(
        x_nchw, w_hwio, window_strides=(2, 2), padding=((1, 1), (1, 1)),
        dimension_numbers=("NCHW", "HWIO", "NCHW"))
    return y + b.reshape(1, -1, 1, 1)


# --------------------------------------------------------------------------
if __name__ == "__main__":
    N, dim_in, dim_out, H, W = 2, 4, 16, 16, 16

    key = jax.random.PRNGKey(0)
    k1, k2, k3 = jax.random.split(key, 3)
    x = jax.random.normal(k1, (N, dim_in, H, W), jnp.float32)          # NCHW
    w = jax.random.normal(k2, (3, 3, dim_in, dim_out), jnp.float32) / math.sqrt(9.0 * dim_in)
    b = 0.1 * jax.random.normal(k3, (dim_out,), jnp.float32)

    ref = downsample_ref(x, w, b)

    # f32 MXU path: tight correctness check.
    out_f32 = jax.block_until_ready(downsample_pallas(x, w, b, mxu_dtype=jnp.float32))
    assert out_f32.shape == (N, dim_out, H // 2, W // 2)
    assert jnp.allclose(out_f32, ref, rtol=1e-4, atol=1e-4), float(
        jnp.max(jnp.abs(out_f32 - ref)))

    # bf16 MXU path (v6e/v7x fast path; f32 accumulation): loose check.
    out_bf16 = jax.block_until_ready(downsample_pallas(x, w, b, mxu_dtype=jnp.bfloat16))
    assert out_bf16.shape == (N, dim_out, H // 2, W // 2)
    assert jnp.allclose(out_bf16, ref, rtol=3e-2, atol=3e-2), float(
        jnp.max(jnp.abs(out_bf16 - ref)))

    print("KERNEL_OK")
</pallas_src>

<mosaic_0001>
module attributes {stable_mosaic.version = 11 : i64} {
  func.func @_downsample_kernel(%arg0: i32, %arg1: memref<1x8x8x16xf32, #tpu.memory_space<vmem>>, %arg2: memref<16x64xf32, #tpu.memory_space<vmem>>, %arg3: memref<16x1xf32, #tpu.memory_space<vmem>>, %arg4: memref<1x16x64xf32, #tpu.memory_space<vmem>>, %arg5: memref<9x9x16xf32, #tpu.memory_space<vmem>>) attributes {dimension_semantics = [#tpu.dimension_semantics<parallel>], iteration_bounds = array<i64: 2>, scalar_prefetch = 0 : i64, scratch_operands = 1 : i64, tpu.core_type = #tpu.core_type<tc>, window_params = [{transform_indices = @transform_0, window_bounds = array<i64: 1, 8, 8, 16>}, {pipeline_mode = #tpu.pipeline_mode<synchronous>, transform_indices = @transform_1, window_bounds = array<i64: 16, 64>}, {pipeline_mode = #tpu.pipeline_mode<synchronous>, transform_indices = @transform_2, window_bounds = array<i64: 16, 1>}, {transform_indices = @transform_3, window_bounds = array<i64: 1, 16, 64>}]} {
    %cst = arith.constant 0.000000e+00 : f32
    %0 = vector.broadcast %cst : f32 to vector<9x9x16xf32>
    %c0 = arith.constant 0 : index
    %c0_0 = arith.constant 0 : index
    %c0_1 = arith.constant 0 : index
    %1 = vector.load %arg5[%c0, %c0_0, %c0_1] : memref<9x9x16xf32, #tpu.memory_space<vmem>>, vector<9x9x16xf32>
    tpu.vector_store %arg5[%c0, %c0_0, %c0_1], %0 {strides = array<i32>} : memref<9x9x16xf32, #tpu.memory_space<vmem>>, vector<9x9x16xf32>,
    %c0_2 = arith.constant 0 : index
    %c0_3 = arith.constant 0 : index
    %c0_4 = arith.constant 0 : index
    %c0_5 = arith.constant 0 : index
    %2 = vector.load %arg1[%c0_2, %c0_3, %c0_4, %c0_5] : memref<1x8x8x16xf32, #tpu.memory_space<vmem>>, vector<1x8x8x16xf32>
    %3 = vector.shape_cast %2 : vector<1x8x8x16xf32> to vector<8x8x16xf32>
    %c1 = arith.constant 1 : index
    %c1_6 = arith.constant 1 : index
    %c0_7 = arith.constant 0 : index
    %4 = vector.load %arg5[%c1, %c1_6, %c0_7] : memref<9x9x16xf32, #tpu.memory_space<vmem>>, vector<8x8x16xf32>
    tpu.vector_store %arg5[%c1, %c1_6, %c0_7], %3 {strides = array<i32>} : memref<9x9x16xf32, #tpu.memory_space<vmem>>, vector<8x8x16xf32>,
    %c0_8 = arith.constant 0 : index
    %c0_9 = arith.constant 0 : index
    %c0_10 = arith.constant 0 : index
    %5 = vector.load %arg5[%c0_8, %c0_9, %c0_10] : memref<9x9x16xf32, #tpu.memory_space<vmem>>, vector<9x9x16xf32>
    %6 = vector.extract_strided_slice %5 {offsets = [0, 0, 0], sizes = [8, 8, 16], strides = [1, 1, 1]} : vector<9x9x16xf32> to vector<8x8x16xf32>
    %7 = vector.extract_strided_slice %5 {offsets = [0, 1, 0], sizes = [8, 8, 16], strides = [1, 1, 1]} : vector<9x9x16xf32> to vector<8x8x16xf32>
    %8 = vector.extract_strided_slice %5 {offsets = [1, 0, 0], sizes = [8, 8, 16], strides = [1, 1, 1]} : vector<9x9x16xf32> to vector<8x8x16xf32>
    %9 = vector.extract_strided_slice %5 {offsets = [1, 1, 0], sizes = [8, 8, 16], strides = [1, 1, 1]} : vector<9x9x16xf32> to vector<8x8x16xf32>
    %10 = tpu.concatenate %6, %7, %8, %9 in 2 : vector<8x8x16xf32>, vector<8x8x16xf32>, vector<8x8x16xf32>, vector<8x8x16xf32> -> vector<8x8x64xf32>
    %11 = vector.shape_cast %10 : vector<8x8x64xf32> to vector<64x64xf32>
    %c0_11 = arith.constant 0 : index
    %c0_12 = arith.constant 0 : index
    %12 = vector.load %arg2[%c0_11, %c0_12] : memref<16x64xf32, #tpu.memory_space<vmem>>, vector<16x64xf32>
    %cst_13 = arith.constant dense<0.000000e+00> : vector<16x64xf32>
    %13 = tpu.matmul %12, %11, %cst_13 {dimension_numbers = #tpu.dot_dimension_numbers<[1], [1], [0], [0], [0, 0, 1, 0], [], []>} : vector<16x64xf32>, vector<64x64xf32>, vector<16x64xf32> -> vector<16x64xf32>
    %c0_14 = arith.constant 0 : index
    %c0_15 = arith.constant 0 : index
    %14 = vector.load %arg3[%c0_14, %c0_15] : memref<16x1xf32, #tpu.memory_space<vmem>>, vector<16x1xf32>
    %15 = vector.broadcast %14 : vector<16x1xf32> to vector<16x64xf32>
    %16 = arith.addf %13, %15 : vector<16x64xf32>
    %c0_16 = arith.constant 0 : index
    %c0_17 = arith.constant 0 : index
    %c0_18 = arith.constant 0 : index
    %17 = vector.load %arg4[%c0_16, %c0_17, %c0_18] : memref<1x16x64xf32, #tpu.memory_space<vmem>>, vector<1x16x64xf32>
    %18 = vector.shape_cast %17 : vector<1x16x64xf32> to vector<16x64xf32>
    %19 = vector.shape_cast %16 : vector<16x64xf32> to vector<1x16x64xf32>
    tpu.vector_store %arg4[%c0_16, %c0_17, %c0_18], %19 {strides = array<i32>} : memref<1x16x64xf32, #tpu.memory_space<vmem>>, vector<1x16x64xf32>,
    return
  }
  func.func @transform_0(%arg0: i32) -> (i32, i32, i32, i32) {
    %c0_i32 = arith.constant 0 : i32
    %c0_i32_0 = arith.constant 0 : i32
    %c0_i32_1 = arith.constant 0 : i32
    %c0_i32_2 = arith.constant 0 : i32
    return %arg0, %c0_i32, %c0_i32_0, %c0_i32_1 : i32, i32, i32, i32
  }
  func.func @transform_1(%arg0: i32) -> (i32, i32) {
    %c0_i32 = arith.constant 0 : i32
    %c0_i32_0 = arith.constant 0 : i32
    %c0_i32_1 = arith.constant 0 : i32
    return %c0_i32, %c0_i32_0 : i32, i32
  }
  func.func @transform_2(%arg0: i32) -> (i32, i32) {
    %c0_i32 = arith.constant 0 : i32
    %c0_i32_0 = arith.constant 0 : i32
    %c0_i32_1 = arith.constant 0 : i32
    return %c0_i32, %c0_i32_0 : i32, i32
  }
  func.func @transform_3(%arg0: i32) -> (i32, i32, i32) {
    %c0_i32 = arith.constant 0 : i32
    %c0_i32_0 = arith.constant 0 : i32
    %c0_i32_1 = arith.constant 0 : i32
    return %arg0, %c0_i32, %c0_i32_0 : i32, i32, i32
  }
}

</mosaic_0001>

<bundles_post_ra>
// kernel: tpu_custom_call.1
= control target key start
LH: loop header
LB: loop body
LE: loop exit
PB: predicated region body
PF: predicated region fallthrough
CT: control target
= control target key end

     0   :  { %8 = vsyncpa [#allocation4], 0  ;;  %s1239_s0 = inlined_call_operand.hbm [shape: f32[2,8,8,16], index: 0, kind: input, shape index: {}]   ;;  %s1240_s1 = inlined_call_operand.vmem [shape: f32[16,64], index: 1, kind: input, shape index: {}]   ;;  %s1241_s2 = inlined_call_operand.vmem [shape: f32[16,1], index: 2, kind: input, shape index: {}]   ;;  %s1242_s3 = inlined_call_operand.hbm [shape: f32[2,16,64], index: 3, kind: output, shape index: {}]  }
   0x1   :  { %10 = vsyncpa [#allocation4 + $0x1], 0 }
   0x2   :  { %11 = vsyncpa [#allocation5], 0 }
   0x3   :  { %13 = vsyncpa [#allocation5 + $0x1], 0  ;;  %s922_s12 = smov 0   ;;  %s924_s13 = smov 0  }
   0x4   :  { %s926_s14 = smov 0   ;;  %s928_s15 = smov 0  }
   0x5 LB: > { %s943_s16 = sadd.s32 4294967295, %s889_s15   ;;  %s597_s17 = sadd.s32 4294967294, %s889_s15   ;;  %s889_s15 = sphi %s928_s15, %s1257_s15   ;;  %s885_s14 = sphi %s926_s14, %s1256_s14   ;;  %s881_s13 = sphi %s924_s13, %s1255_s13   ;;  %s877_s12 = sphi %s922_s12, %s1254_s12  }
   0x6   : > { %s947_s18 = sadd.s32 1, %s889_s15   ;;  %s26_s19 = sadd.s32 1, %s885_s14 }
   0x7   : > { %s23_s20 = ssub.s32 %s889_s15, %s947_s18  ;;  %p33_p0 = scmp.ne.s32.totalorder %s885_s14, %s881_s13 }
   0x8   : > { %p24_p1 = scmp.eq.s32.totalorder %s23_s20, 0  ;;  %p34_p2 = scmp.eq.s32.totalorder %s889_s15, 0 }
   0x9   : > { %p39_p3 = scmp.ne.s32.totalorder %s881_s13, %s877_s12  ;;  %p40_p4 = scmp.eq.s32.totalorder %s943_s16, 0 }
   0xa   : > { %s959_s21 = scalar_select %p24_p1, %s885_s14, %s26_s19  }
   0xb   : > { %p961_p5 = por %p34_p2, %p33_p0  ;;  %p965_p6 = por %p40_p4, %p39_p3 }
   0xc   : > { %p105_p7 = scmp.eq.s32.totalorder %s943_s16, 1  ;;  %p111_p8 = scmp.eq.s32.totalorder %s597_s17, 1 }
   0xd   : > { %p688_p10 = scmp.lt.s32.totalorder %s889_s15, 2  ;;  %s137_s26 = sand.u32 1, %s885_s14  }
   0xe   : > { %p972_p11 = por %p105_p7, %p33_p0  ;;  %p976_p12 = por %p111_p8, %p39_p3 }
   0xf   : > { %s621_s27 = sshll.u32 %s889_s15, 10  ;;  %s600_s28 = sshll.u32 %s137_s26, 6 }
  0x10   : > { %s1246_s24 = scalar_select %p972_p11, 1, 0 }
  0x11   : > { %s1247_s25 = scalar_select %p976_p12, 1, 0 }
  0x12   : > { %s985_s4 = scalar_lea.hbm %s1239_s0, %s621_s27  ;;  %s141_s5 = scalar_lea.vmem [#allocation3], %s600_s28 }
  0x13   : > { %s148_s6 = sshll.u32 %s141_s5, 4  ;;  %p989_p13 = pnand %p688_p10, %p961_p5  ;;  %s993_s6 = int_to_ptr.vmem [resolvable:$true] %s148_s6 }
  0x14   : > { %s995_s8 = scalar_lea.sflag [#allocation4], %s137_s26  ;;  %s793_s9 = scalar_lea.hbm %s985_s4, 1024 }
  0x15   : > { %p794_p0 = scmp.ne.s32.totalorder %s985_s4, %s793_s9  ;;  %p795_p1 = pneg %p989_p13 }
  0x16   : > { %s798_s17 = scalar_lea.hbm %s1239_s0, 2048  ;;  %p799_p4 = scmp.lt.u32.totalorder %s985_s4, %s1239_s0 }
  0x17   : > { %p796_p2 = pnand %p795_p1, %p794_p0  ;;  %p800_p5 = scmp.lt.u32.totalorder %s798_s17, %s793_s9 }
  0x18   : > { %p802_p8 = scmp.lt.u32.totalorder %s793_s9, %s985_s4 }
  0x19   : > { %p797_p3 = pneg %p796_p2  ;;  %p801_p7 = por %p800_p5, %p799_p4 }
  0x1b   : > { %p803_p10 = por %p802_p8, %p801_p7 }
  0x1d   : > { %p804_p9 = pnand %p803_p10, %p797_p3 }
  0x1f   : > { %807 = shalt.err (!%p804_p9)
}
  0x20   : > { %s808_s22 = scalar_lea.vmem %s993_s6, 1024  ;;  %s891_s26 = smov [#allocation3]  }
  0x21   : > { %p809_p0 = scmp.ne.s32.totalorder %s993_s6, %s808_s22  ;;  %s813_s27 = sshll.u32 %s891_s26, 4  ;;  %s814_s27 = int_to_ptr.vmem [resolvable:$false] %s813_s27 }
  0x22   : > { %s815_s28 = scalar_lea.vmem %s814_s27, 2048  ;;  %p816_p11 = scmp.lt.s32.totalorder %s993_s6, %s814_s27 }
  0x23   : > { %p811_p2 = pnand %p809_p0, %p795_p1  ;;  %p817_p4 = scmp.lt.s32.totalorder %s815_s28, %s808_s22 }
  0x25   : > { %p812_p12 = pneg %p811_p2  ;;  %p818_p5 = por %p817_p4, %p816_p11 }
  0x27   : > { %p819_p7 = pnand %p818_p5, %p812_p12 }
  0x29   : > { %822 = shalt.err (!%p819_p7)
}
  0x2a   : > { %s892_s29 = smov 128   ;;  %s893_s30 = smov 8  }
  0x2b   : > { %683 = dma.hbm_to_vmem [thread:$0]  (!%p989_p13), %s985_s4, 1024, %s993_s6, %s995_s8, %s892_s29, %s892_s29, %s893_s30  }
  0x2c   : > { %p603_p9 = scmp.ge.s32.totalorder %s889_s15, 1  ;;  %p156_p1 = scmp.lt.s32.totalorder %s889_s15, 3 }
  0x2e   : > { %p157_p3 = pnand %p603_p9, %p156_p1 }
  0x2f   : > { %s1026_s5 = sand.u32 (!%p157_p3), 1, %s881_s13  }
  0x30   : > { %160 = sbr.rel (%p157_p3) target bundleno = 466 (0x1d2), region = 32  ;;  %s604_s9 = sshll.u32 (!%p157_p3), %s1026_s5, 6 }
  0x31   : > { %s163_s10 = scalar_lea.sflag (!%p157_p3), [#allocation4], %s1026_s5  ;;  %s1030_s11 = scalar_lea.vmem (!%p157_p3), [#allocation3], %s604_s9 }
  0x37   : > { %868 = dma.done.wait (%p965_p6), %s163_s10, 1024  }
  0x38   : > { %870 = vsyncadd (%p965_p6), %s163_s10, 4294966272  ;;  %vm189_vm0 = vcmask 130048   ;;  %vm191_vm1 = vcmask 122880   ;;  %v894_v0 = vmov 0.0   ;;  %v209_v1 = vld [vmem:[%s1030_s11] sm:$0xff]  ;;  %v210_v2 = vld [vmem:[%s1030_s11 + $0x8] sm:$0xff] }
  0x39   : > { %190 = vst.msk [vmem:[#allocation2] sm:$0xff] %vm189_vm0, %v894_v0  ;;  %193 = vst.msk [vmem:[#allocation2 + $0x10] sm:$0xff] %vm189_vm0, %v894_v0  ;;  %v211_v3 = vld [vmem:[%s1030_s11 + $0x10] sm:$0xff]  ;;  %v212_v6 = vld [vmem:[%s1030_s11 + $0x18] sm:$0xff]  ;;  %vm260_vm2 = vcmask 1046528   ;;  %s895_s23 = smov 16  }
  0x3a   : > { %192 = vst.msk [vmem:[#allocation2 + $0x8] sm:$0x1] %vm191_vm1, %v894_v0  ;;  %194 = vst.msk [vmem:[#allocation2 + $0x18] sm:$0x1] %vm191_vm1, %v894_v0  ;;  %v213_v7 = vld [vmem:[%s1030_s11 + $0x20] sm:$0xff]  ;;  %v214_v8 = vld [vmem:[%s1030_s11 + $0x28] sm:$0xff] }
  0x3b   : > { %195 = vst.msk [vmem:[#allocation2 + $0x20] sm:$0xff] %vm189_vm0, %v894_v0  ;;  %197 = vst.msk [vmem:[#allocation2 + $0x30] sm:$0xff] %vm189_vm0, %v894_v0  ;;  %v215_v9 = vld [vmem:[%s1030_s11 + $0x30] sm:$0xff]  ;;  %v216_v10 = vld [vmem:[%s1030_s11 + $0x38] sm:$0xff]  ;;  %s896_s4 = smov 48   ;;  %s897_s6 = smov 32  }
  0x3c   : > { %196 = vst.msk [vmem:[#allocation2 + $0x28] sm:$0x1] %vm191_vm1, %v894_v0  ;;  %198 = vst.msk [vmem:[#allocation2 + $0x38] sm:$0x1] %vm191_vm1, %v894_v0  ;;  %vm402_vm3 = vcmask 523264   ;;  %vm370_vm4 = vcmask 261120  }
  0x3d   : > { %199 = vst.msk [vmem:[#allocation2 + $0x40] sm:$0xff] %vm189_vm0, %v894_v0  ;;  %201 = vst.msk [vmem:[#allocation2 + $0x50] sm:$0xff] %vm189_vm0, %v894_v0  ;;  %vm379_vm5 = vcmask 392192   ;;  %s605_s28 = sshll.u32 %s1026_s5, 4  ;;  %s622_s9 = sshll.u32 %s943_s16, 8 }
  0x3e   : > { %200 = vst.msk [vmem:[#allocation2 + $0x48] sm:$0x1] %vm191_vm1, %v894_v0  ;;  %202 = vst.msk [vmem:[#allocation2 + $0x58] sm:$0x1] %vm191_vm1, %v894_v0  ;;  %s188_s29 = scalar_lea.vmem [#allocation6], %s605_s28  ;;  %s511_s16 = scalar_lea.sflag [#allocation5], %s1026_s5 }
  0x3f   : > { %203 = vst.msk [vmem:[#allocation2 + $0x60] sm:$0xff] %vm189_vm0, %v894_v0  ;;  %205 = vst.msk [vmem:[#allocation2 + $0x70] sm:$0xff] %vm189_vm0, %v894_v0  ;;  %s524_s30 = sshll.u32 %s188_s29, 4  ;;  %p1251_p11 = scmp.ne.s32.totalorder %s1246_s24, 0  ;;  %s1188_s30 = int_to_ptr.vmem [resolvable:$true] %s524_s30 }
  0x40   : > { %204 = vst.msk [vmem:[#allocation2 + $0x68] sm:$0x1] %vm191_vm1, %v894_v0  ;;  %206 = vst.msk [vmem:[#allocation2 + $0x78] sm:$0x1] %vm191_vm1, %v894_v0  ;;  %v1058_v4 = vld [vmem:[#allocation2] sm:$0xff] }
  0x41   : > { %207 = vst.msk [vmem:[#allocation2 + $0x80] sm:$0xff] %vm189_vm0, %v894_v0  ;;  %218 = vst.msk [vmem:[#allocation2 + $0x11] sm:$0xff] %vm189_vm0, %v209_v1  ;;  %v227_v5 = vld [vmem:[#allocation2 + $0x8] sm:$0x1]  ;;  %v261_v11 = vrot.slane %v1058_v4, 1 }
  0x42   : > { %208 = vst.msk [vmem:[#allocation2 + $0x88] sm:$0x1] %vm191_vm1, %v894_v0  ;;  %v262_v12 = vrot.slane %v227_v5, 1  ;;  %v390_v5 = vld [vmem:[%s1241_s2] sm:$0xff]  ;;  %vm1142_vm6 = vmpackc.low %vm402_vm3, %vm402_vm3 }
  0x43   : > { %219 = vst.msk [vmem:[#allocation2 + $0x21] sm:$0xff] %vm189_vm0, %v210_v2  ;;  %220 = vst.msk [vmem:[#allocation2 + $0x31] sm:$0xff] %vm189_vm0, %v211_v3  ;;  %v388_v2 = vld [vmem:[%s1240_s1] sm:$0xff]  ;;  %v391_v3 = vld [vmem:[%s1241_s2 + $0x8] sm:$0xff] }
  0x44   : > { %221 = vst.msk [vmem:[#allocation2 + $0x41] sm:$0xff] %vm189_vm0, %v212_v6  ;;  %222 = vst.msk [vmem:[#allocation2 + $0x51] sm:$0xff] %vm189_vm0, %v213_v7  ;;  %v263_v16 = vsel %vm260_vm2, %v261_v11, %v262_v12  ;;  %649 = vmatprep.mubr.msk.f32.mxu0 %vm402_vm3, %v388_v2  ;;  %v898_v6 = vmov 0  }
  0x45   : > { %223 = vst.msk [vmem:[#allocation2 + $0x61] sm:$0xff] %vm189_vm0, %v214_v8  ;;  %224 = vst.msk [vmem:[#allocation2 + $0x71] sm:$0xff] %vm189_vm0, %v215_v9  ;;  %792 = vset.pattern.permute.xlu1 %v898_v6  ;;  %791 = vset.pattern.permute.xlu0 %v898_v6 }
  0x46   : > { %225 = vst.msk [vmem:[#allocation2 + $0x81] sm:$0xff] %vm189_vm0, %v216_v10 }
  0x48   : > { %v1073_v13 = vld [vmem:[#allocation2 + $0x10] sm:$0xff]  ;;  %v229_v14 = vld [vmem:[#allocation2 + $0x18] sm:$0x1] }
  0x49   : > { %v264_v17 = vrot.slane %v1073_v13, 1  ;;  %v265_v18 = vrot.slane %v229_v14, 1 }
  0x4a   : > { %v1075_v15 = vld [vmem:[#allocation2 + $0x20] sm:$0xff]  ;;  %v231_v19 = vld [vmem:[#allocation2 + $0x28] sm:$0x1]  ;;  %v1079_v20 = vld [vmem:[#allocation2 + $0x30] sm:$0xff] }
  0x4b   : > { %v267_v21 = vrot.slane %v1075_v15, 1  ;;  %v233_v22 = vld [vmem:[#allocation2 + $0x38] sm:$0x1]  ;;  %v268_v23 = vrot.slane %v231_v19, 1  ;;  %v270_v24 = vrot.slane %v1079_v20, 1  ;;  %v1083_v25 = vld [vmem:[#allocation2 + $0x40] sm:$0xff]  ;;  %v266_v26 = vsel %vm260_vm2, %v264_v17, %v265_v18 }
  0x4c   : > { %v271_v27 = vrot.slane %v233_v22, 1  ;;  %v235_v28 = vld [vmem:[#allocation2 + $0x48] sm:$0x1]  ;;  %v731_v29 = vpack.i.bf16 %v266_v26, %v263_v16  ;;  %v273_v31 = vrot.slane %v1083_v25, 1  ;;  %v1088_v33 = vld [vmem:[#allocation2 + $0x50] sm:$0xff]  ;;  %v736_v37 = vpack.i.bf16 %v1075_v15, %v1073_v13  ;;  %v1097_v42 = vld [vmem:[#allocation2 + $0x60] sm:$0xff] }
  0x4d   : > { %v269_v30 = vsel %vm260_vm2, %v267_v21, %v268_v23  ;;  %v274_v32 = vrot.slane %v235_v28, 1  ;;  %v237_v34 = vld [vmem:[#allocation2 + $0x58] sm:$0x1]  ;;  %v276_v39 = vrot.slane %v1088_v33, 1  ;;  %v239_v43 = vld [vmem:[#allocation2 + $0x68] sm:$0x1]  ;;  %v741_v46 = vpack.i.bf16 %v1083_v25, %v1079_v20 }
  0x4e   : > { %v272_v35 = vsel %vm260_vm2, %v270_v24, %v271_v27  ;;  %v746_v36 = vpack.i.bf16 %v269_v30, %v266_v26  ;;  %732 = vrot.lane.b32.xlu0 %v731_v29, %s895_s23  ;;  %v277_v40 = vrot.slane %v237_v34, 1  ;;  %v1099_v44 = vld [vmem:[#allocation2 + $0x70] sm:$0xff]  ;;  %v241_v45 = vld [vmem:[#allocation2 + $0x78] sm:$0x1]  ;;  %v279_v49 = vrot.slane %v1097_v42, 1  ;;  %v242_v53 = vld [vmem:[#allocation2 + $0x80] sm:$0xff] }
  0x4f   : > { %v751_v38 = vpack.i.bf16 %v272_v35, %v269_v30  ;;  %v275_v41 = vsel %vm260_vm2, %v273_v31, %v274_v32  ;;  %v280_v50 = vrot.slane %v239_v43, 1  ;;  %v282_v51 = vrot.slane %v1099_v44, 1  ;;  %v243_v54 = vld [vmem:[#allocation2 + $0x88] sm:$0x1] }
  0x50   : > { %747 = vrot.lane.b32.xlu1 %v746_v36, %s896_s4  ;;  %v756_v47 = vpack.i.bf16 %v275_v41, %v272_v35  ;;  %v278_v48 = vsel %vm260_vm2, %v276_v39, %v277_v40  ;;  %v283_v52 = vrot.slane %v241_v45, 1  ;;  %v761_v56 = vpack.i.bf16 %v1097_v42, %v1088_v33 }
  0x51   : > { %v766_v55 = vpack.i.bf16 %v278_v48, %v275_v41  ;;  %v281_v57 = vsel %vm260_vm2, %v279_v49, %v280_v50  ;;  %v335_v59 = vrot.slane %v242_v53, 1  ;;  %v336_v60 = vrot.slane %v243_v54, 1 }
  0x52   : > { %737 = vrot.lane.b32.xlu0 %v736_v37, %s897_s6  ;;  %v284_v58 = vsel %vm260_vm2, %v282_v51, %v283_v52  ;;  %v771_v61 = vpack.i.bf16 %v281_v57, %v278_v48  ;;  %v776_v0 = vpack.i.bf16 %v242_v53, %v1099_v44 }
  0x53   : > { %v781_v62 = vpack.i.bf16 %v284_v58, %v281_v57  ;;  %v337_v63 = vsel %vm260_vm2, %v335_v59, %v336_v60 }
  0x54   : > { %752 = vrot.lane.b32.xlu1 %v751_v38, %s895_s23  ;;  %v786_v1 = vpack.i.bf16 %v337_v63, %v284_v58 }
  0x56   : > { %742 = vrot.lane.b32.xlu0 %v741_v46, %s897_s6 }
  0x58   : > { %757 = vrot.lane.b32.xlu1 %v756_v47, %s896_s4 }
  0x5a   : > { %767 = vrot.lane.b32.xlu0 %v766_v55, %s895_s23 }
  0x5c   : > { %762 = vrot.lane.b32.xlu1 %v761_v56, %s897_s6 }
  0x5e   : > { %772 = vrot.lane.b32.xlu0 %v771_v61, %s896_s4 }
  0x60   : > { %782 = vrot.lane.b32.xlu1 %v781_v62, %s895_s23  ;;  %s1193_s23 = scalar_lea.hbm %s1242_s3, %s622_s9 }
  0x62   : > { %777 = vrot.lane.b32.xlu0 %v776_v0, %s897_s6  ;;  %s899_s6 = smov [#allocation6]  }
  0x63   : > { %s827_s7 = sshll.u32 %s899_s6, 4  ;;  %s828_s7 = int_to_ptr.vmem [resolvable:$false] %s827_s7 }
  0x64   : > { %787 = vrot.lane.b32.xlu1 %v786_v1, %s896_s4  ;;  %s823_s4 = scalar_lea.vmem %s1188_s30, 256  ;;  %s829_s8 = scalar_lea.vmem %s828_s7, 512 }
  0x65   : > { %p824_p6 = scmp.ne.s32.totalorder %s1188_s30, %s823_s4  ;;  %p830_p8 = scmp.lt.s32.totalorder %s1188_s30, %s828_s7 }
  0x66   : > { %394 = vperm.xlu0 %791, %v390_v5   ;;  %p831_p10 = scmp.lt.s32.totalorder %s829_s8, %s823_s4 }
  0x67   : > { %p825_p12 = pnand %p824_p6, %p1251_p11 }
  0x68   : > { %399 = vperm.xlu1 %792, %v391_v3   ;;  %p832_p0 = por %p831_p10, %p830_p8 }
  0x69   : > { %p826_p13 = pneg %p825_p12 }
  0x6b   : > { %p833_p2 = pnand %p832_p0, %p826_p13 }
  0xc0   : > { %v733_v7 = vpop.permute.xlu0 %732 }
  0xc1   : > { %v735_v9 = vunpack.i.h.bf16 %v733_v7  ;;  %v734_v10 = vunpack.i.l.bf16 %v733_v7 }
  0xc2   : > { %v748_v8 = vpop.permute.xlu1 %747 }
  0xc3   : > { %v750_v11 = vunpack.i.h.bf16 %v748_v8  ;;  %v749_v12 = vunpack.i.l.bf16 %v748_v8  ;;  %v363_v19 = vsel %vm189_vm0, %v1073_v13, %v735_v9  ;;  %v362_v21 = vsel %vm189_vm0, %v1058_v4, %v734_v10  ;;  %v389_v8 = vld [vmem:[%s1240_s1 + $0x8] sm:$0xff] }
  0xc4   : > { %v738_v14 = vpop.permute.xlu0 %737 }
  0xc5   : > { %v740_v16 = vunpack.i.h.bf16 %v738_v14  ;;  %v739_v17 = vunpack.i.l.bf16 %v738_v14 }
  0xc6   : > { %v753_v18 = vpop.permute.xlu1 %752 }
  0xc7   : > { %v755_v22 = vunpack.i.h.bf16 %v753_v18  ;;  %v754_v23 = vunpack.i.l.bf16 %v753_v18  ;;  %v371_v24 = vsel %vm370_vm4, %v362_v21, %v739_v17  ;;  %v372_v26 = vsel %vm370_vm4, %v363_v19, %v740_v16 }
  0xc8   : > { %v743_v29 = vpop.permute.xlu0 %742  ;;  %v380_v30 = vsel %vm379_vm5, %v371_v24, %v749_v12  ;;  %v381_v13 = vsel %vm379_vm5, %v372_v26, %v750_v11 }
  0xc9   : > { %v365_v27 = vsel %vm189_vm0, %v1079_v20, %v755_v22  ;;  %v364_v28 = vsel %vm189_vm0, %v1075_v15, %v754_v23  ;;  %v745_v31 = vunpack.i.h.bf16 %v743_v29  ;;  %v744_v32 = vunpack.i.l.bf16 %v743_v29 }
  0xca   : > { %v758_v34 = vpop.permute.xlu1 %757  ;;  %v652_v35 = vpack.c.bf16 %v381_v13, %v380_v30 }
  0xcb   : > { %v760_v36 = vunpack.i.h.bf16 %v758_v34  ;;  %v759_v20 = vunpack.i.l.bf16 %v758_v34  ;;  %v374_v37 = vsel %vm370_vm4, %v365_v27, %v745_v31  ;;  %v373_v15 = vsel %vm370_vm4, %v364_v28, %v744_v32 }
  0xcc   : > { %654 = vmatprep.subr.msk.bf16.mxu0 %vm1142_vm6, %v652_v35  ;;  %v768_v40 = vpop.permute.xlu0 %767 }
  0xcd   : > { %v382_v38 = vsel %vm379_vm5, %v373_v15, %v759_v20  ;;  %v383_v39 = vsel %vm379_vm5, %v374_v37, %v760_v36  ;;  %657 = vmatpush3.bf16.xpose.msk.msra.mxu0 %vm1142_vm6, %v652_v35  ;;  %v770_v43 = vunpack.i.h.bf16 %v768_v40  ;;  %v769_v45 = vunpack.i.l.bf16 %v768_v40 }
  0xce   : > { %v658_v41 = vpack.c.bf16 %v383_v39, %v382_v38  ;;  %v763_v46 = vpop.permute.xlu1 %762 }
  0xcf   : > { %v765_v47 = vunpack.i.h.bf16 %v763_v46  ;;  %v764_v48 = vunpack.i.l.bf16 %v763_v46  ;;  %v367_v49 = vsel %vm189_vm0, %v1088_v33, %v770_v43  ;;  %v366_v50 = vsel %vm189_vm0, %v1083_v25, %v769_v45 }
  0xd0   : > { %660 = vmatprep.subr.msk.bf16.mxu0 %vm1142_vm6, %v658_v41  ;;  %v773_v53 = vpop.permute.xlu0 %772 }
  0xd1   : > { %v375_v51 = vsel %vm370_vm4, %v366_v50, %v764_v48  ;;  %v376_v52 = vsel %vm370_vm4, %v367_v49, %v765_v47  ;;  %v775_v54 = vunpack.i.h.bf16 %v773_v53  ;;  %v774_v55 = vunpack.i.l.bf16 %v773_v53 }
  0xd2   : > { %v783_v56 = vpop.permute.xlu1 %782 }
  0xd3   : > { %v785_v57 = vunpack.i.h.bf16 %v783_v56  ;;  %v784_v58 = vunpack.i.l.bf16 %v783_v56  ;;  %v384_v59 = vsel %vm379_vm5, %v375_v51, %v774_v55  ;;  %v385_v33 = vsel %vm379_vm5, %v376_v52, %v775_v54 }
  0xd4   : > { %v664_v60 = vpack.c.bf16 %v385_v33, %v384_v59  ;;  %v778_v62 = vpop.permute.xlu0 %777 }
  0xd5   : > { %663 = vmatpush3.bf16.xpose.msk.msra.mxu0 %vm1142_vm6, %v658_v41  ;;  %v369_v25 = vsel %vm189_vm0, %v1099_v44, %v785_v57  ;;  %v368_v61 = vsel %vm189_vm0, %v1097_v42, %v784_v58  ;;  %v780_v63 = vunpack.i.h.bf16 %v778_v62  ;;  %v779_v0 = vunpack.i.l.bf16 %v778_v62 }
  0xd6   : > { %v788_v1 = vpop.permute.xlu1 %787  ;;  %666 = vmatprep.subr.msk.bf16.mxu0 %vm1142_vm6, %v664_v60 }
  0xd7   : > { %v790_v2 = vunpack.i.h.bf16 %v788_v1  ;;  %v789_v3 = vunpack.i.l.bf16 %v788_v1  ;;  %v378_v5 = vsel %vm370_vm4, %v369_v25, %v780_v63  ;;  %v377_v6 = vsel %vm370_vm4, %v368_v61, %v779_v0 }
  0xd9   : > { %v386_v44 = vsel %vm379_vm5, %v377_v6, %v789_v3  ;;  %v387_v7 = vsel %vm379_vm5, %v378_v5, %v790_v2 }
  0xda   : > { %v670_v42 = vpack.c.bf16 %v387_v7, %v386_v44 }
  0xdd   : > { %669 = vmatpush3.bf16.xpose.msk.msra.mxu0 %vm1142_vm6, %v664_v60 }
  0xde   : > { %672 = vmatprep.subr.msk.bf16.mxu0 %vm1142_vm6, %v670_v42 }
  0xe5   : > { %675 = vmatpush3.bf16.xpose.msk.msra.mxu0 %vm1142_vm6, %v670_v42  ;;  %v395_v10 = vpop.permute.xlu0 %394 }
  0xe7   : > { %v400_v9 = vpop.permute.xlu1 %399 }
  0xec   : > { %650 = vmatmul.mubr.msk.f32.vlgmr.msra.gmra.mrb[0].mxu0 %vm402_vm3, %v389_v8 }
 0x1bf   : > { %v651_v11 = vpop.f32.mrb[0].mxu0 }
 0x1c0   : > { %v505_v12 = vadd.f32 %v651_v11, %v400_v9  ;;  %v499_v14 = vpop.f32.mrb[1].mxu0 }
 0x1c1   : > { %v500_v16 = vadd.f32 %v499_v14, %v395_v10 }
 0x1c2   : > { %509 = vst.msk [vmem:[%s188_s29 + $0x8] sm:$0xff] %vm402_vm3, %v505_v12 }
 0x1c3   : > { %508 = vst.msk [vmem:[%s188_s29] sm:$0xff] %vm402_vm3, %v500_v16 }
 0x1c4   : > { %836 = shalt.err (!%p833_p2)
}
 0x1c5   : > { %s837_s17 = scalar_lea.hbm %s1193_s23, 256  ;;  %s841_s22 = scalar_lea.hbm %s1242_s3, 512 }
 0x1c6   : > { %p838_p4 = scmp.ne.s32.totalorder %s1193_s23, %s837_s17  ;;  %p842_p9 = scmp.lt.u32.totalorder %s1193_s23, %s1242_s3 }
 0x1c7   : > { %p843_p1 = scmp.lt.u32.totalorder %s841_s22, %s837_s17  ;;  %p845_p6 = scmp.lt.u32.totalorder %s837_s17, %s1193_s23 }
 0x1c8   : > { %p839_p5 = pnand %p838_p4, %p1251_p11 }
 0x1c9   : > { %p844_p3 = por %p843_p1, %p842_p9 }
 0x1ca   : > { %p840_p7 = pneg %p839_p5 }
 0x1cb   : > { %p846_p12 = por %p845_p6, %p844_p3 }
 0x1cd   : > { %p847_p13 = pnand %p846_p12, %p840_p7 }
 0x1cf   : > { %850 = shalt.err (!%p847_p13)
}
 0x1d0   : > { %s900_s28 = smov 128   ;;  %s901_s29 = smov 8  }
 0x1d1   : > { %678 = dma.vmem_to_hbm [thread:$0]  (%p1251_p11), %s1188_s30, 256, %s1193_s23, %s511_s16, %s900_s28, %s900_s28, %s901_s29  }
 0x1d2 PF: > { %s539_s9 = sand.u32 1, %s877_s12   ;;  %p1252_p8 = scmp.ne.s32.totalorder %s1247_s25, 0 }
 0x1d3   : > { %p1253_p10 = scmp.ge.s32.totalorder %s889_s15, 2  ;;  %s540_s10 = scalar_lea.sflag [#allocation5], %s539_s9 }
 0x1d5   : > { %p685_p0 = pnand %p1253_p10, %p1252_p8 }
 0x1d7   : > { %872 = dma.done.wait (!%p685_p0), %s540_s10, 256  }
 0x1d8   : > { %874 = vsyncadd (!%p685_p0), %s540_s10, 4294967040  ;;  %p16_p2 = scmp.ge.s32.totalorder %s947_s18, 4   ;;  %s1254_s12 = smov %s881_s13 }
 0x1d9   : > { %s1255_s13 = smov %s885_s14  ;;  %s1256_s14 = smov %s959_s21 }
 0x1da   : > { %s1257_s15 = smov %s947_s18  ;;  %18 = sbr.rel (!%p16_p2) target bundleno = 5 (0x5), region = 78 }
 0x1e1   :  { %545 = vsyncpa [#allocation4], 1 }
 0x1e2   :  { %547 = vsyncpa [#allocation4 + $0x1], 1 }
 0x1e3   :  { %548 = vsyncpa [#allocation5], 1 }
 0x1e4   :  { %550 = vsyncpa [#allocation5 + $0x1], 1 }

</bundles_post_ra>
